<compile_context>
chip_gen: v7x
topology: tpu7x:2x2x1
jax: 0.10.0
libtpu: 0.0.40
codegen_flags: <defaults>
</compile_context>

<pallas_src>
import jax
import jax.numpy as jnp
from jax.experimental import pallas as pl
from jax.experimental.pallas import tpu as pltpu


def temporal_attn_kernel(hs_ref, w1_ref, w2a_ref, w2b_ref, att_ref, attw_ref):
    hs = hs_ref[...]                                   # (BB, T, H) streaming dtype
    T = hs.shape[1]
    hs_f32 = hs.astype(jnp.float32)

    # MXU precision: f32 operands (the PyTorch spec) keep full precision —
    # the kernel is HBM-bandwidth bound so the extra MXU passes are hidden;
    # bf16 operands use the fast single-pass path with f32 accumulation.
    prec = (jax.lax.Precision.HIGHEST
            if hs_ref.dtype == jnp.float32 else jax.lax.Precision.DEFAULT)

    h_t = hs[:, T - 1, :]                              # (BB, H) last hidden state

    # fc1 reassociated: score[b, t] = <hs[b,t,:], (h_t[b,:] @ W1)>
    v = jnp.dot(h_t, w1_ref[...], precision=prec,
                preferred_element_type=jnp.float32)    # (BB, H) f32

    # Softmax over time in a (BB, T, 1) keepdims layout (T on sublanes),
    # matching the hs broadcasts — no lane<->sublane relayouts.
    score = jnp.sum(hs_f32 * v[:, None, :], axis=2, keepdims=True)   # (BB, T, 1)
    m = jnp.max(score, axis=1, keepdims=True)
    e = jnp.exp(score - m)
    denom = jnp.sum(e, axis=1, keepdims=True)
    # EUP approx reciprocal + one Newton-Raphson step: divide moves off the
    # VPU, accuracy stays ~1e-6 relative (addresses the review's tolerance
    # concern with approx=True alone).
    r = pl.reciprocal(denom, approx=True)
    r = r * (2.0 - denom * r)
    attn_w = e * r                                                    # (BB, T, 1)

    # context[b, :] = sum_t attn_w[b, t] * hs[b, t, :]  (VPU mul + sublane reduce)
    context = jnp.sum(hs_f32 * attn_w, axis=1)                        # (BB, H) f32

    # fc2 split into two K=H MXU dots (no lane-axis concat):
    #   att = tanh(context @ W2[:, :H].T + h_t @ W2[:, H:].T)
    pre = jnp.dot(context.astype(w2a_ref.dtype), w2a_ref[...], precision=prec,
                  preferred_element_type=jnp.float32)
    pre = pre + jnp.dot(h_t, w2b_ref[...], precision=prec,
                        preferred_element_type=jnp.float32)
    att = jnp.tanh(pre)

    att_ref[...] = att.astype(att_ref.dtype)
    attw_ref[...] = attn_w[:, :, 0].astype(attw_ref.dtype)


def _choose_block_b(batch, seq, hidden, itemsize, target_bytes):
    """Batch tile: ~target_bytes of hs per grid step, a multiple of 8
    (sublane), and at least 2 grid steps when possible (v7x megacore)."""
    if batch <= 8:
        return batch
    row_bytes = seq * hidden * itemsize
    bb = max(8, (target_bytes // row_bytes) // 8 * 8)
    half = max(8, (batch // 2) // 8 * 8)      # guarantee >= 2 grid steps
    return int(min(bb, half))


def temporal_attn(hidden_states, w1, w2, *,
                  target_block_bytes=2 * 1024 * 1024,
                  vmem_limit_bytes=32 * 1024 * 1024):
    """hidden_states: (B, T, H); w1: (H, H); w2: (H, 2H) (nn.Linear (out, in)).

    hidden_states may be f32 (matches the PyTorch module) or bf16 (halves HBM
    traffic for this memory-bound kernel; accumulation stays f32 in-kernel).
    """
    B, T, H = hidden_states.shape
    assert w1.shape == (H, H) and w2.shape == (H, 2 * H)

    # Pre-split + pre-transpose fc2 so the kernel issues two K=H dots.
    w2a = jnp.transpose(w2[:, :H])    # context path (H, H)
    w2b = jnp.transpose(w2[:, H:])    # h_t path     (H, H)

    BB = _choose_block_b(B, T, H, hidden_states.dtype.itemsize, target_block_bytes)
    n_main = (B // BB) * BB

    def call(hs_op, n_rows, bb):
        grid = (n_rows // bb,)
        cost = pl.CostEstimate(
            flops=int(n_rows * (6 * H * H + 5 * T * H)),
            transcendentals=int(n_rows * (T + H + 1)),
            bytes_accessed=int(n_rows * T * H * hs_op.dtype.itemsize
                               + 3 * H * H * w1.dtype.itemsize
                               + n_rows * (H + T) * hidden_states.dtype.itemsize),
        )
        grid_spec = pltpu.PrefetchScalarGridSpec(
            num_scalar_prefetch=0,
            grid=grid,
            in_specs=[
                pl.BlockSpec((bb, T, H), lambda b: (b, 0, 0)),
                # Constant-index weight blocks. For production H (>= 1024) add
                # pipeline_mode=pl.Buffered(1) here so ~3*H^2 of constants are
                # not double-buffered in VMEM; at small H it is negligible.
                pl.BlockSpec((H, H), lambda b: (0, 0)),
                pl.BlockSpec((H, H), lambda b: (0, 0)),
                pl.BlockSpec((H, H), lambda b: (0, 0)),
            ],
            out_specs=[
                pl.BlockSpec((bb, H), lambda b: (b, 0)),
                pl.BlockSpec((bb, T), lambda b: (b, 0)),
            ],
        )
        return pl.pallas_call(
            temporal_attn_kernel,
            out_shape=(
                jax.ShapeDtypeStruct((n_rows, H), hidden_states.dtype),
                jax.ShapeDtypeStruct((n_rows, T), hidden_states.dtype),
            ),
            grid_spec=grid_spec,
            compiler_params=pltpu.CompilerParams(
                dimension_semantics=("parallel",),
                vmem_limit_bytes=vmem_limit_bytes,
            ),
            cost_estimate=cost,
        )(hs_op, w1, w2a, w2b)

    # TODO(synk): for deployments with H < 128, a lane-dense (B, T*H) layout of
    # hs would avoid 4x lane waste; left as a model-level layout decision.
    outs = []
    if n_main > 0:
        # Full hidden_states is passed; the grid only visits the first
        # n_main // BB blocks, so no wrapper-side pad/copy of hs is needed.
        outs.append(call(hidden_states, n_main, BB))
    if n_main < B:
        # Remainder rows (< BB of them): one extra single-step call on a small
        # slice, with full-extent blocks so no sublane-multiple is required.
        rem = B - n_main
        outs.append(call(hidden_states[n_main:], rem, rem))

    if len(outs) == 1:
        return outs[0]
    att = jnp.concatenate([o[0] for o in outs], axis=0)
    attw = jnp.concatenate([o[1] for o in outs], axis=0)
    return att, attw


def temporal_attn_ref(hidden_states, w1, w2):
    """Pure-JAX reference mirroring the PyTorch forward (full f32 precision)."""
    hp = jax.lax.Precision.HIGHEST
    sfp = jnp.einsum('bth,oh->bto', hidden_states, w1, precision=hp)
    h_t = hidden_states[:, -1, :]
    score = jnp.einsum('bto,bo->bt', sfp, h_t, precision=hp)
    attn_w = jax.nn.softmax(score, axis=1)
    context = jnp.einsum('bth,bt->bh', hidden_states, attn_w, precision=hp)
    pre = jnp.concatenate([context, h_t], axis=1)
    att = jnp.tanh(jnp.einsum('bi,oi->bo', pre, w2, precision=hp))
    return att, attn_w


if __name__ == "__main__":
    key = jax.random.PRNGKey(0)
    k_x, k_w1, k_w2, k_x2 = jax.random.split(key, 4)

    B, T, H = 16, 8, 32
    hidden_states = jax.random.normal(k_x, (B, T, H), dtype=jnp.float32)
    # Deterministic synthetic weights (nn.Linear layout: (out, in), bias=False).
    w1 = jax.random.normal(k_w1, (H, H), dtype=jnp.float32) * (1.0 / jnp.sqrt(H))
    w2 = jax.random.normal(k_w2, (H, 2 * H), dtype=jnp.float32) * (1.0 / jnp.sqrt(2.0 * H))

    att, attw = temporal_attn(hidden_states, w1, w2)
    jax.block_until_ready((att, attw))
    att_r, attw_r = temporal_attn_ref(hidden_states, w1, w2)
    assert jnp.allclose(att, att_r, atol=2e-4, rtol=2e-4), "attention_vector mismatch"
    assert jnp.allclose(attw, attw_r, atol=2e-4, rtol=2e-4), "attention_weights mismatch"

    # Ragged batch: exercises the main + remainder path (no full-tensor pad).
    B2 = 13
    hs2 = jax.random.normal(k_x2, (B2, T, H), dtype=jnp.float32)
    att2, attw2 = temporal_attn(hs2, w1, w2)
    jax.block_until_ready((att2, attw2))
    att2_r, attw2_r = temporal_attn_ref(hs2, w1, w2)
    assert jnp.allclose(att2, att2_r, atol=2e-4, rtol=2e-4), "ragged attention_vector mismatch"
    assert jnp.allclose(attw2, attw2_r, atol=2e-4, rtol=2e-4), "ragged attention_weights mismatch"

    print("KERNEL_OK")
</pallas_src>

<mosaic_0001>
module attributes {stable_mosaic.version = 11 : i64} {
  func.func @temporal_attn_kernel(%arg0: i32, %arg1: memref<8x8x32xf32, #tpu.memory_space<vmem>>, %arg2: memref<32x32xf32, #tpu.memory_space<vmem>>, %arg3: memref<32x32xf32, #tpu.memory_space<vmem>>, %arg4: memref<32x32xf32, #tpu.memory_space<vmem>>, %arg5: memref<8x32xf32, #tpu.memory_space<vmem>>, %arg6: memref<8x8xf32, #tpu.memory_space<vmem>>) attributes {dimension_semantics = [#tpu.dimension_semantics<parallel>], iteration_bounds = array<i64: 2>, scalar_prefetch = 0 : i64, scratch_operands = 0 : i64, tpu.core_type = #tpu.core_type<tc>, window_params = [{transform_indices = @transform_0, window_bounds = array<i64: 8, 8, 32>}, {pipeline_mode = #tpu.pipeline_mode<synchronous>, transform_indices = @transform_1, window_bounds = array<i64: 32, 32>}, {pipeline_mode = #tpu.pipeline_mode<synchronous>, transform_indices = @transform_2, window_bounds = array<i64: 32, 32>}, {pipeline_mode = #tpu.pipeline_mode<synchronous>, transform_indices = @transform_3, window_bounds = array<i64: 32, 32>}, {transform_indices = @transform_4, window_bounds = array<i64: 8, 32>}, {transform_indices = @transform_5, window_bounds = array<i64: 8, 8>}]} {
    %c0 = arith.constant 0 : index
    %c0_0 = arith.constant 0 : index
    %c0_1 = arith.constant 0 : index
    %0 = vector.load %arg1[%c0, %c0_0, %c0_1] : memref<8x8x32xf32, #tpu.memory_space<vmem>>, vector<8x8x32xf32>
    %1 = vector.extract_strided_slice %0 {offsets = [0, 7, 0], sizes = [8, 1, 32], strides = [1, 1, 1]} : vector<8x8x32xf32> to vector<8x1x32xf32>
    %2 = vector.shape_cast %1 : vector<8x1x32xf32> to vector<8x32xf32>
    %c0_2 = arith.constant 0 : index
    %c0_3 = arith.constant 0 : index
    %3 = vector.load %arg2[%c0_2, %c0_3] : memref<32x32xf32, #tpu.memory_space<vmem>>, vector<32x32xf32>
    %cst = arith.constant dense<0.000000e+00> : vector<8x32xf32>
    %4 = tpu.matmul %2, %3, %cst {dimension_numbers = #tpu.dot_dimension_numbers<[1], [0], [0], [1], [0, 0, 1, 1], [], []>, precision = #tpu.contract_precision<fp32>} : vector<8x32xf32>, vector<32x32xf32>, vector<8x32xf32> -> vector<8x32xf32>
    %5 = vector.shape_cast %4 : vector<8x32xf32> to vector<8x1x32xf32>
    %6 = vector.broadcast %5 : vector<8x1x32xf32> to vector<8x8x32xf32>
    %7 = arith.mulf %0, %6 : vector<8x8x32xf32>
    %cst_4 = arith.constant dense<0.000000e+00> : vector<8x8xf32>
    %8 = vector.multi_reduction <add>, %7, %cst_4 [2] : vector<8x8x32xf32> to vector<8x8xf32>
    %9 = vector.shape_cast %8 : vector<8x8xf32> to vector<8x8x1xf32>
    %cst_5 = arith.constant dense<0xFF800000> : vector<8x1xf32>
    %10 = vector.multi_reduction <maximumf>, %9, %cst_5 [1] : vector<8x8x1xf32> to vector<8x1xf32>
    %11 = vector.shape_cast %10 : vector<8x1xf32> to vector<8x1x1xf32>
    %12 = vector.broadcast %11 : vector<8x1x1xf32> to vector<8x8x1xf32>
    %13 = arith.subf %9, %12 : vector<8x8x1xf32>
    %14 = math.exp %13 : vector<8x8x1xf32>
    %cst_6 = arith.constant dense<0.000000e+00> : vector<8x1xf32>
    %15 = vector.multi_reduction <add>, %14, %cst_6 [1] : vector<8x8x1xf32> to vector<8x1xf32>
    %16 = vector.shape_cast %15 : vector<8x1xf32> to vector<8x1x1xf32>
    %17 = tpu.reciprocal %16 {approx = true} : vector<8x1x1xf32> -> vector<8x1x1xf32>
    %18 = arith.mulf %16, %17 : vector<8x1x1xf32>
    %cst_7 = arith.constant 2.000000e+00 : f32
    %19 = vector.broadcast %cst_7 : f32 to vector<8x1x1xf32>
    %20 = arith.subf %19, %18 : vector<8x1x1xf32>
    %21 = arith.mulf %17, %20 : vector<8x1x1xf32>
    %22 = vector.broadcast %21 : vector<8x1x1xf32> to vector<8x8x1xf32>
    %23 = arith.mulf %14, %22 : vector<8x8x1xf32>
    %24 = vector.broadcast %23 : vector<8x8x1xf32> to vector<8x8x32xf32>
    %25 = arith.mulf %0, %24 : vector<8x8x32xf32>
    %cst_8 = arith.constant dense<0.000000e+00> : vector<8x32xf32>
    %26 = vector.multi_reduction <add>, %25, %cst_8 [1] : vector<8x8x32xf32> to vector<8x32xf32>
    %c0_9 = arith.constant 0 : index
    %c0_10 = arith.constant 0 : index
    %27 = vector.load %arg3[%c0_9, %c0_10] : memref<32x32xf32, #tpu.memory_space<vmem>>, vector<32x32xf32>
    %cst_11 = arith.constant dense<0.000000e+00> : vector<8x32xf32>
    %28 = tpu.matmul %26, %27, %cst_11 {dimension_numbers = #tpu.dot_dimension_numbers<[1], [0], [0], [1], [0, 0, 1, 1], [], []>, precision = #tpu.contract_precision<fp32>} : vector<8x32xf32>, vector<32x32xf32>, vector<8x32xf32> -> vector<8x32xf32>
    %c0_12 = arith.constant 0 : index
    %c0_13 = arith.constant 0 : index
    %29 = vector.load %arg4[%c0_12, %c0_13] : memref<32x32xf32, #tpu.memory_space<vmem>>, vector<32x32xf32>
    %cst_14 = arith.constant dense<0.000000e+00> : vector<8x32xf32>
    %30 = tpu.matmul %2, %29, %cst_14 {dimension_numbers = #tpu.dot_dimension_numbers<[1], [0], [0], [1], [0, 0, 1, 1], [], []>, precision = #tpu.contract_precision<fp32>} : vector<8x32xf32>, vector<32x32xf32>, vector<8x32xf32> -> vector<8x32xf32>
    %31 = arith.addf %28, %30 : vector<8x32xf32>
    %32 = math.tanh %31 : vector<8x32xf32>
    %c0_15 = arith.constant 0 : index
    %c0_16 = arith.constant 0 : index
    %33 = vector.load %arg5[%c0_15, %c0_16] : memref<8x32xf32, #tpu.memory_space<vmem>>, vector<8x32xf32>
    tpu.vector_store %arg5[%c0_15, %c0_16], %32 {strides = array<i32>} : memref<8x32xf32, #tpu.memory_space<vmem>>, vector<8x32xf32>,
    %34 = vector.shape_cast %23 : vector<8x8x1xf32> to vector<8x8xf32>
    %c0_17 = arith.constant 0 : index
    %c0_18 = arith.constant 0 : index
    %35 = vector.load %arg6[%c0_17, %c0_18] : memref<8x8xf32, #tpu.memory_space<vmem>>, vector<8x8xf32>
    tpu.vector_store %arg6[%c0_17, %c0_18], %34 {strides = array<i32>} : memref<8x8xf32, #tpu.memory_space<vmem>>, vector<8x8xf32>,
    return
  }
  func.func @transform_0(%arg0: i32) -> (i32, i32, i32) {
    %c0_i32 = arith.constant 0 : i32
    %c0_i32_0 = arith.constant 0 : i32
    %c0_i32_1 = arith.constant 0 : i32
    return %arg0, %c0_i32, %c0_i32_0 : i32, i32, i32
  }
  func.func @transform_1(%arg0: i32) -> (i32, i32) {
    %c0_i32 = arith.constant 0 : i32
    %c0_i32_0 = arith.constant 0 : i32
    %c0_i32_1 = arith.constant 0 : i32
    return %c0_i32, %c0_i32_0 : i32, i32
  }
  func.func @transform_2(%arg0: i32) -> (i32, i32) {
    %c0_i32 = arith.constant 0 : i32
    %c0_i32_0 = arith.constant 0 : i32
    %c0_i32_1 = arith.constant 0 : i32
    return %c0_i32, %c0_i32_0 : i32, i32
  }
  func.func @transform_3(%arg0: i32) -> (i32, i32) {
    %c0_i32 = arith.constant 0 : i32
    %c0_i32_0 = arith.constant 0 : i32
    %c0_i32_1 = arith.constant 0 : i32
    return %c0_i32, %c0_i32_0 : i32, i32
  }
  func.func @transform_4(%arg0: i32) -> (i32, i32) {
    %c0_i32 = arith.constant 0 : i32
    %c0_i32_0 = arith.constant 0 : i32
    return %arg0, %c0_i32 : i32, i32
  }
  func.func @transform_5(%arg0: i32) -> (i32, i32) {
    %c0_i32 = arith.constant 0 : i32
    %c0_i32_0 = arith.constant 0 : i32
    return %arg0, %c0_i32 : i32, i32
  }
}

</mosaic_0001>

<bundles_post_ra>
// kernel: tpu_custom_call.1
= control target key start
LH: loop header
LB: loop body
LE: loop exit
PB: predicated region body
PF: predicated region fallthrough
CT: control target
= control target key end

     0   :  { %11 = vsyncpa [#allocation3], 0  ;;  %s3768_s0 = inlined_call_operand.hbm [shape: f32[16,8,32], index: 0, kind: input, shape index: {}]   ;;  %s3769_s1 = inlined_call_operand.hbm [shape: f32[32,32], index: 1, kind: input, shape index: {}]   ;;  %s3770_s2 = inlined_call_operand.hbm [shape: f32[32,32], index: 2, kind: input, shape index: {}]   ;;  %s3771_s3 = inlined_call_operand.hbm [shape: f32[32,32], index: 3, kind: input, shape index: {}]   ;;  %s3772_s4 = inlined_call_operand.hbm [shape: f32[16,32], index: 4, kind: output, shape index: {0}]   ;;  %s3773_s5 = inlined_call_operand.vmem [shape: f32[16,8], index: 5, kind: output, shape index: {1}]  }
   0x1   :  { %13 = vsyncpa [#allocation3 + $0x1], 0 }
   0x2   :  { %14 = vsyncpa [#allocation6], 0 }
   0x3   :  { %15 = vsyncpa [#allocation9], 0 }
   0x4   :  { %16 = vsyncpa [#allocation4], 0 }
   0x5   :  { %18 = vsyncpa [#allocation4 + $0x1], 0  ;;  %s3163_s18 = smov 0   ;;  %s3165_s19 = smov 0  }
   0x6   :  { %s3167_s20 = smov 0   ;;  %s3169_s21 = smov 0  }
   0x7 LB: > { %s3184_s22 = sadd.s32 4294967295, %s3120_s21   ;;  %s2367_s23 = sadd.s32 4294967294, %s3120_s21   ;;  %s3120_s21 = sphi %s3169_s21, %s3796_s21   ;;  %s3116_s20 = sphi %s3167_s20, %s3795_s20   ;;  %s3112_s19 = sphi %s3165_s19, %s3794_s19   ;;  %s3108_s18 = sphi %s3163_s18, %s3793_s18  }
   0x8   : > { %p44_p0 = scmp.ne.s32.totalorder %s3112_s19, %s3108_s18  ;;  %p3774_p1 = scmp.eq.s32.totalorder %s3184_s22, 0 }
   0x9   : > { %p137_p3 = scmp.eq.s32.totalorder %s2367_s23, 1  ;;  %p2368_p5 = scmp.ge.s32.totalorder %s3120_s21, 1 }
   0xa   : > { %p3193_p4 = por %p3774_p1, %p44_p0  ;;  %p170_p7 = scmp.lt.s32.totalorder %s3120_s21, 3 }
   0xb   : > { %p3198_p6 = por %p137_p3, %p44_p0  ;;  %s3122_s27 = smov [#allocation5]  }
   0xc   : > { %s3777_s24 = scalar_select %p3193_p4, 1, 0 }
   0xd   : > { %s3778_s25 = scalar_select %p3198_p6, 1, 0 }
   0xe   : > { %p3203_p8 = pnand %p2368_p5, %p170_p7  ;;  %s182_s28 = sshll.u32 %s3122_s27, 4  ;;  %s3207_s28 = int_to_ptr.vmem [resolvable:$true] %s182_s28 }
   0xf   : > { %s3123_s30 = smov [#allocation7]   ;;  %s3124_s7 = smov [#allocation8]  }
  0x10   : > { %s3779_s26 = scalar_select %p3203_p8, 1, 0 }
  0x11   : > { %p2831_p9 = pneg %p3203_p8  ;;  %s195_s6 = sshll.u32 %s3123_s30, 4  ;;  %s3218_s6 = int_to_ptr.vmem [resolvable:$true] %s195_s6 }
  0x12   : > { %s3220_s8 = sshll.u32 %s3124_s7, 4  ;;  %s2932_s11 = scalar_lea.hbm %s3769_s1, 512  ;;  %s209_s8 = int_to_ptr.vmem [resolvable:$true] %s3220_s8 }
  0x13   : > { %p3214_p11 = pnand %p2831_p9, %p3774_p1  ;;  %p2933_p12 = scmp.ne.s32.totalorder %s3769_s1, %s2932_s11 }
  0x14   : > { %p2939_p5 = scmp.lt.u32.totalorder %s2932_s11, %s3769_s1 }
  0x15   : > { %p3230_p13 = pneg %p3214_p11 }
  0x17   : > { %p2935_p0 = pnand %p3230_p13, %p2933_p12 }
  0x19   : > { %p2936_p3 = pneg %p2935_p0 }
  0x1b   : > { %p2941_p7 = pnand %p2939_p5, %p2936_p3 }
  0x1d   : > { %2944 = shalt.err (!%p2941_p7)
}
  0x1e   : > { %s2945_s17 = scalar_lea.vmem %s3207_s28, 512  ;;  %p2953_p2 = scmp.lt.s32.totalorder %s3207_s28, %s3207_s28 }
  0x1f   : > { %p2946_p9 = scmp.ne.s32.totalorder %s3207_s28, %s2945_s17  ;;  %p2954_p6 = scmp.lt.s32.totalorder %s2945_s17, %s2945_s17 }
  0x21   : > { %p2948_p10 = pnand %p2946_p9, %p3230_p13  ;;  %p2955_p12 = por %p2954_p6, %p2953_p2 }
  0x23   : > { %p2949_p1 = pneg %p2948_p10 }
  0x25   : > { %p2956_p0 = pnand %p2955_p12, %p2949_p1 }
  0x27   : > { %2959 = shalt.err (!%p2956_p0)
}
  0x28   : > { %s3125_s23 = smov 128   ;;  %s3126_s27 = smov 8  }
  0x29   : > { %2834 = dma.hbm_to_vmem [thread:$0]  (!%p3214_p11), %s3769_s1, 512, %s3207_s28, [#allocation6], %s3125_s23, %s3125_s23, %s3126_s27  }
  0x2a   : > { %s2960_s11 = scalar_lea.hbm %s3770_s2, 512 }
  0x2b   : > { %p2961_p1 = scmp.ne.s32.totalorder %s3770_s2, %s2960_s11  ;;  %p2967_p10 = scmp.lt.u32.totalorder %s2960_s11, %s3770_s2 }
  0x2d   : > { %p2963_p2 = pnand %p2961_p1, %p3230_p13 }
  0x2f   : > { %p2964_p6 = pneg %p2963_p2 }
  0x31   : > { %p2969_p3 = pnand %p2967_p10, %p2964_p6 }
  0x33   : > { %2972 = shalt.err (!%p2969_p3)
}
  0x34   : > { %s2973_s28 = scalar_lea.vmem %s3218_s6, 512  ;;  %p2981_p12 = scmp.lt.s32.totalorder %s3218_s6, %s3218_s6 }
  0x35   : > { %p2974_p5 = scmp.ne.s32.totalorder %s3218_s6, %s2973_s28  ;;  %p2982_p0 = scmp.lt.s32.totalorder %s2973_s28, %s2973_s28 }
  0x37   : > { %p2976_p7 = pnand %p2974_p5, %p3230_p13  ;;  %p2983_p1 = por %p2982_p0, %p2981_p12 }
  0x39   : > { %p2977_p9 = pneg %p2976_p7 }
  0x3b   : > { %p2984_p2 = pnand %p2983_p1, %p2977_p9 }
  0x3d   : > { %2987 = shalt.err (!%p2984_p2)
}
  0x3e   : > { %2837 = dma.hbm_to_vmem [thread:$0]  (!%p3214_p11), %s3770_s2, 512, %s3218_s6, [#allocation6], %s3125_s23, %s3125_s23, %s3126_s27  }
  0x3f   : > { %s2988_s10 = scalar_lea.hbm %s3771_s3, 512 }
  0x40   : > { %p2989_p6 = scmp.ne.s32.totalorder %s3771_s3, %s2988_s10  ;;  %p2995_p5 = scmp.lt.u32.totalorder %s2988_s10, %s3771_s3 }
  0x42   : > { %p2991_p10 = pnand %p2989_p6, %p3230_p13 }
  0x44   : > { %p2992_p3 = pneg %p2991_p10 }
  0x46   : > { %p2997_p7 = pnand %p2995_p5, %p2992_p3 }
  0x48   : > { %3000 = shalt.err (!%p2997_p7)
}
  0x49   : > { %s3001_s16 = scalar_lea.vmem %s209_s8, 512  ;;  %p3009_p1 = scmp.lt.s32.totalorder %s209_s8, %s209_s8 }
  0x4a   : > { %p3002_p9 = scmp.ne.s32.totalorder %s209_s8, %s3001_s16  ;;  %p3010_p2 = scmp.lt.s32.totalorder %s3001_s16, %s3001_s16 }
  0x4c   : > { %p3004_p12 = pnand %p3002_p9, %p3230_p13  ;;  %p3011_p4 = por %p3010_p2, %p3009_p1 }
  0x4e   : > { %p3005_p0 = pneg %p3004_p12 }
  0x50   : > { %p3012_p8 = pnand %p3011_p4, %p3005_p0 }
  0x52   : > { %3015 = shalt.err (!%p3012_p8)
}
  0x53   : > { %2840 = dma.hbm_to_vmem [thread:$0]  (!%p3214_p11), %s3771_s3, 512, %s209_s8, [#allocation9], %s3125_s23, %s3125_s23, %s3126_s27  }
  0x54   : > { %s3303_s14 = sadd.s32 1, %s3120_s21   ;;  %s31_s17 = sadd.s32 1, %s3116_s20 }
  0x55   : > { %s28_s29 = ssub.s32 %s3120_s21, %s3303_s14  ;;  %p38_p8 = scmp.ne.s32.totalorder %s3116_s20, %s3112_s19 }
  0x56   : > { %p29_p4 = scmp.eq.s32.totalorder %s28_s29, 0  ;;  %p39_p13 = scmp.eq.s32.totalorder %s3120_s21, 0 }
  0x57   : > { %p2852_p6 = scmp.lt.s32.totalorder %s3120_s21, 2  ;;  %p3782_p3 = scmp.eq.s32.totalorder %s3184_s22, 1 }
  0x58   : > { %s3313_s30 = scalar_select %p29_p4, %s3116_s20, %s31_s17  }
  0x59   : > { %p40_p10 = por %p39_p13, %p38_p8  ;;  %p3317_p5 = por %p3782_p3, %p38_p8 }
  0x5a   : > { %s222_s9 = sand.u32 1, %s3116_s20   ;;  %s2387_s10 = sshll.u32 %s3120_s21, 10 }
  0x5b   : > { %s2373_s8 = sshll.u32 %s222_s9, 6  ;;  %s3326_s13 = scalar_lea.hbm %s3768_s0, %s2387_s10 }
  0x5c   : > { %s226_s15 = scalar_lea.vmem [#allocation2], %s2373_s8  ;;  %p3328_p11 = pnand %p2852_p6, %p40_p10 }
  0x5d   : > { %s233_s16 = sshll.u32 %s226_s15, 4  ;;  %s3334_s28 = scalar_lea.sflag [#allocation3], %s222_s9  ;;  %s3332_s16 = int_to_ptr.vmem [resolvable:$true] %s233_s16 }
  0x5e   : > { %s3016_s29 = scalar_lea.hbm %s3326_s13, 1024  ;;  %p3018_p9 = pneg %p3328_p11 }
  0x5f   : > { %p3017_p7 = scmp.ne.s32.totalorder %s3326_s13, %s3016_s29  ;;  %s3021_s8 = scalar_lea.hbm %s3768_s0, 2048 }
  0x60   : > { %p3022_p1 = scmp.lt.u32.totalorder %s3326_s13, %s3768_s0  ;;  %p3023_p2 = scmp.lt.u32.totalorder %s3021_s8, %s3016_s29 }
  0x61   : > { %p3019_p12 = pnand %p3018_p9, %p3017_p7  ;;  %p3025_p8 = scmp.lt.u32.totalorder %s3016_s29, %s3326_s13 }
  0x62   : > { %p3024_p4 = por %p3023_p2, %p3022_p1 }
  0x63   : > { %p3020_p0 = pneg %p3019_p12 }
  0x64   : > { %p3026_p13 = por %p3025_p8, %p3024_p4 }
  0x66   : > { %p3027_p6 = pnand %p3026_p13, %p3020_p0 }
  0x68   : > { %3030 = shalt.err (!%p3027_p6)
}
  0x69   : > { %s3031_s9 = scalar_lea.vmem %s3332_s16, 1024  ;;  %s3127_s15 = smov [#allocation2]  }
  0x6a   : > { %p3032_p10 = scmp.ne.s32.totalorder %s3332_s16, %s3031_s9  ;;  %s3036_s17 = sshll.u32 %s3127_s15, 4  ;;  %s3037_s17 = int_to_ptr.vmem [resolvable:$false] %s3036_s17 }
  0x6b   : > { %s3038_s10 = scalar_lea.vmem %s3037_s17, 2048  ;;  %p3039_p12 = scmp.lt.s32.totalorder %s3332_s16, %s3037_s17 }
  0x6c   : > { %p3034_p3 = pnand %p3032_p10, %p3018_p9  ;;  %p3040_p1 = scmp.lt.s32.totalorder %s3038_s10, %s3031_s9 }
  0x6e   : > { %p3035_p7 = pneg %p3034_p3  ;;  %p3041_p2 = por %p3040_p1, %p3039_p12 }
  0x70   : > { %p3042_p4 = pnand %p3041_p2, %p3035_p7 }
  0x72   : > { %3045 = shalt.err (!%p3042_p4)
}
  0x73   : > { %2844 = dma.hbm_to_vmem [thread:$0]  (!%p3328_p11), %s3326_s13, 1024, %s3332_s16, %s3334_s28, %s3125_s23, %s3125_s23, %s3126_s27  }
  0x74   : > { %p3785_p9 = scmp.ne.s32.totalorder %s3779_s26, 0 }
  0x75   : > { %s3368_s29 = sand.u32 (!%p3785_p9), 1, %s3112_s19   ;;  %p3786_p0 = scmp.ne.s32.totalorder (!%p3785_p9), %s3777_s24, 0 }
  0x76   : > { %245 = sbr.rel (%p3785_p9) target bundleno = 941 (0x3ad), region = 36  ;;  %s2377_s8 = sshll.u32 (!%p3785_p9), %s3368_s29, 6 }
  0x77   : > { %s248_s11 = scalar_lea.sflag (!%p3785_p9), [#allocation3], %s3368_s29  ;;  %s3372_s12 = scalar_lea.vmem (!%p3785_p9), [#allocation2], %s2377_s8 }
  0x7d   : > { %3091 = dma.done.wait (%p3786_p0), %s248_s11, 1024  }
  0x7e   : > { %3093 = vsyncadd (%p3786_p0), %s248_s11, 4294966272  ;;  %p3787_p11 = scmp.eq.s32.totalorder %s3184_s22, 0 }
  0x80   : > { %3095 = dma.done.wait (%p3787_p11), [#allocation6], 1024   ;;  %p3788_p8 = pmov %p3787_p11 }
  0x82   : > { %3097 = vsyncadd (%p3788_p8), [#allocation6], 4294966272  ;;  %p3789_p13 = pmov %p3788_p8 }
  0x83   : > { %p3790_p6 = pmov %p3788_p8 }
  0x84   : > { %3099 = dma.done.wait (%p3789_p13), [#allocation9], 512  }
  0x85   : > { %3101 = vsyncadd (%p3790_p6), [#allocation9], 4294966784  ;;  %v3128_v0 = vmov 0.0|0.0   ;;  %vm3129_vm0 = vmmov 0   ;;  %v3130_v1 = vmov 0.0   ;;  %v307_v2 = vld [vmem:[#allocation5] sm:$0xff]  ;;  %v833_v62 = vlaneseq }
  0x86   : > { %2676 = vmatprep.subr.bf16.mxu0 %v3128_v0  ;;  %2486 = vmatprep.mubr.msk.f32.mxu0 %vm3129_vm0, %v3130_v1  ;;  %v308_v3 = vld [vmem:[#allocation5 + $0x8] sm:$0xff]  ;;  %v309_v4 = vld [vmem:[#allocation5 + $0x10] sm:$0xff]  ;;  %vm321_vm1 = vcmask 1041409   ;;  %v344_v5 = vand.u32 4294901760, %v307_v2  ;;  %v310_v7 = vld [vmem:[#allocation5 + $0x18] sm:$0xff]  ;;  %vm324_vm2 = vcmask 1042434  }
  0x87   : > { %2730 = vmatprep.subr.bf16.mxu1 %v3128_v0  ;;  %2585 = vmatprep.mubr.msk.f32.mxu1 %vm3129_vm0, %v3130_v1  ;;  %v347_v6 = vand.u32 4294901760, %v308_v3  ;;  %v350_v8 = vand.u32 4294901760, %v309_v4  ;;  %v3393_v9 = vld [vmem:[%s3372_s12] sm:$0xff]  ;;  %v3396_v10 = vld [vmem:[%s3372_s12 + $0x8] sm:$0xff]  ;;  %v353_v11 = vand.u32 4294901760, %v310_v7  ;;  %v3399_v12 = vld [vmem:[%s3372_s12 + $0x10] sm:$0xff] }
  0x88   : > { %v3402_v13 = vld [vmem:[%s3372_s12 + $0x18] sm:$0xff]  ;;  %v3405_v14 = vld [vmem:[%s3372_s12 + $0x20] sm:$0xff]  ;;  %v319_v15 = vrot.slane %v3393_v9, 7  ;;  %v320_v16 = vrot.slane %v3396_v10, 6  ;;  %v3412_v18 = vld [vmem:[%s3372_s12 + $0x28] sm:$0xff]  ;;  %vm327_vm3 = vcmask 1043459   ;;  %v3417_v20 = vsub.f32 %v307_v2, %v344_v5 }
  0x89   : > { %v3409_v17 = vpack.c.bf16 %v347_v6, %v344_v5  ;;  %v3415_v19 = vld [vmem:[%s3372_s12 + $0x30] sm:$0xff]  ;;  %vm330_vm4 = vcmask 1044484   ;;  %v3419_v21 = vsub.f32 %v308_v3, %v347_v6  ;;  %v323_v23 = vrot.slane %v3399_v12, 5  ;;  %v3434_v33 = vld [vmem:[%s3372_s12 + $0x38] sm:$0xff]  ;;  %p295_p10 = scmp.lt.s32.totalorder %s3184_s22, 1  ;;  %s2381_s16 = sshll.u32 %s3368_s29, 3 }
  0x8a   : > { %v322_v22 = vsel %vm321_vm1, %v320_v16, %v319_v15  ;;  %v3424_v24 = vpack.c.bf16 %v353_v11, %v350_v8  ;;  %v326_v25 = vrot.slane %v3402_v13, 4  ;;  %v329_v26 = vrot.slane %v3405_v14, 3  ;;  %s2384_s6 = sshll.u32 %s3184_s22, 7  ;;  %s287_s28 = scalar_lea.vmem [#allocation10], %s2381_s16 }
  0x8b   : > { %2678 = vmatpush3.bf16.msra.mxu0 %v3409_v17  ;;  %v332_v27 = vrot.slane %v3412_v18, 2  ;;  %v325_v28 = vsel %vm324_vm2, %v323_v23, %v322_v22  ;;  %vm333_vm5 = vcmask 1045509   ;;  %v335_v29 = vrot.slane %v3415_v19, 1  ;;  %s3652_s24 = scalar_select %p295_p10, %s3184_s22, 1 }
  0x8c   : > { %2679 = vmatprep.subr.bf16.mxu0 %v3128_v0  ;;  %v438_v30 = vsub.f32 %v309_v4, %v350_v8  ;;  %v328_v31 = vsel %vm327_vm3, %v326_v25, %v325_v28  ;;  %vm336_vm6 = vcmask 1046534   ;;  %vm338_vm7 = vcmask 1047559   ;;  %s2241_s9 = sshll.u32 %s287_s28, 4  ;;  %s3723_s10 = scalar_lea.hbm %s3772_s4, %s2384_s6  ;;  %s3725_s9 = int_to_ptr.vmem [resolvable:$true] %s2241_s9 }
  0x8d   : > { %v445_v32 = vsub.f32 %v310_v7, %v353_v11  ;;  %v331_v34 = vsel %vm330_vm4, %v329_v26, %v328_v31  ;;  %v425_v35 = vand.u32 4294901760, %v3417_v20  ;;  %v432_v36 = vand.u32 4294901760, %v3419_v21  ;;  %s2382_s26 = sshll.u32 %s3652_s24, 3  ;;  %s2224_s8 = scalar_lea.sflag [#allocation4], %s3368_s29 }
  0x8e   : > { %v334_v37 = vsel %vm333_vm5, %v332_v27, %v331_v34  ;;  %vm340_vm8 = vcmask 261120   ;;  %v439_v40 = vand.u32 4294901760, %v438_v30  ;;  %v2689_v58 = vpack.c.bf16 %v3419_v21, %v3417_v20  ;;  %s298_s13 = scalar_lea.vmem %s3773_s5, %s2382_s26  ;;  %s3046_s11 = scalar_lea.vmem %s3725_s9, 128 }
  0x8f   : > { %2681 = vmatpush3.bf16.msra.mxu0 %v3424_v24  ;;  %v337_v38 = vsel %vm336_vm6, %v335_v29, %v334_v37  ;;  %v426_v42 = vsub.f32 %v3417_v20, %v425_v35  ;;  %v433_v43 = vsub.f32 %v3419_v21, %v432_v36  ;;  %v446_v44 = vand.u32 4294901760, %v445_v32  ;;  %p3047_p3 = scmp.ne.s32.totalorder %s3725_s9, %s3046_s11  ;;  %s3132_s22 = smov [#allocation10]  }
  0x90   : > { %2682 = vmatprep.subr.bf16.mxu0 %v3128_v0  ;;  %v339_v39 = vsel %vm338_vm7, %v3434_v33, %v337_v38  ;;  %v440_v49 = vsub.f32 %v438_v30, %v439_v40  ;;  %v2692_v59 = vpack.c.bf16 %v445_v32, %v438_v30  ;;  %v2701_v60 = vpack.c.bf16 %v432_v36, %v425_v35  ;;  %s3050_s12 = sshll.u32 %s3132_s22, 4  ;;  %s3051_s12 = int_to_ptr.vmem [resolvable:$false] %s3050_s12 }
  0x91   : > { %v341_v41 = vsel %vm340_vm8, %v339_v39, 0  ;;  %v427_v47 = vand.u32 4294901760, %v426_v42  ;;  %v434_v48 = vand.u32 4294901760, %v433_v43  ;;  %v447_v50 = vsub.f32 %v445_v32, %v446_v44  ;;  %p3048_p7 = pnand %p3047_p3, %p3317_p5  ;;  %s3052_s24 = scalar_lea.vmem %s3051_s12, 256 }
  0x92   : > { %v3448_v45 = vand.u32 4294901760, %v341_v41  ;;  %v441_v54 = vand.u32 4294901760, %v440_v49  ;;  %v2704_v61 = vpack.c.bf16 %v446_v44, %v439_v40  ;;  %v834_v63 = vshrl.u32 %v833_v62, 7  ;;  %p3053_p1 = scmp.lt.s32.totalorder %s3725_s9, %s3051_s12  ;;  %p3054_p2 = scmp.lt.s32.totalorder %s3052_s24, %s3046_s11 }
  0x93   : > { %v2683_v53 = vpack.c.bf16 %v434_v48, %v427_v47  ;;  %v448_v55 = vand.u32 4294901760, %v447_v50  ;;  %v2180_v2 = vand.u32 127, %v833_v62  ;;  %v3131_v4 = vmov 1966171168   ;;  %p3049_p12 = pneg %p3048_p7 }
  0x94   : > { %v3451_v46 = vsub.f32 %v341_v41, %v3448_v45  ;;  %v831_v5 = vunpack.c.l.s4 %v3131_v4  ;;  %v880_v16 = vsub.s32 0, %v834_v63  ;;  %v1180_v4 = vld [vmem:[#allocation8 + $0x10] sm:$0xff]  ;;  %vm2221_vm9 = vcmask 64512   ;;  %p3055_p4 = por %p3054_p2, %p3053_p1 }
  0x95   : > { %v2686_v57 = vpack.c.bf16 %v448_v55, %v441_v54  ;;  %v3494_v3 = vsub.s32 %v2180_v2, %v834_v63 }
  0x96   : > { %v3454_v51 = vand.u32 4294901760, %v3451_v46  ;;  %v832_v6 = vunpack.c.0.s8 %v831_v5  ;;  %v1181_v5 = vld [vmem:[#allocation8 + $0x18] sm:$0xff]  ;;  %p3056_p9 = pnand %p3055_p4, %p3049_p12 }
  0x98   : > { %v415_v52 = vsub.f32 %v3451_v46, %v3454_v51  ;;  %v835_v7 = vsub.s32 %v832_v6, %v834_v63  ;;  %v1189_v6 = vand.u32 4294901760, %v1180_v4 }
  0x9a   : > { %v3458_v56 = vand.u32 4294901760, %v415_v52 }
  0x9c   : > { %2487 = vmatmul.mubr.f32.vlgmr.msra.gmra.mrb[0].mxu0 %v3458_v56 }
  0x9d   : > { %2684 = vmatpush3.bf16.msra.mxu0 %v2683_v53  ;;  %2497 = vmatprep.mubr.msk.f32.mxu0 %vm3129_vm0, %v3130_v1 }
  0x9e   : > { %2685 = vmatprep.subr.bf16.mxu0 %v3128_v0 }
  0xa1   : > { %2687 = vmatpush3.bf16.msra.mxu0 %v2686_v57 }
  0xa2   : > { %2688 = vmatprep.subr.bf16.mxu0 %v3128_v0 }
  0xa4   : > { %2498 = vmatmul.mubr.f32.vlgmr.msra.gmra.mrb[0].mxu0 %v3448_v45 }
  0xa5   : > { %2690 = vmatpush3.bf16.msra.mxu0 %v2689_v58  ;;  %2508 = vmatprep.mubr.msk.f32.mxu0 %vm3129_vm0, %v3130_v1 }
  0xa6   : > { %2691 = vmatprep.subr.bf16.mxu0 %v3128_v0 }
  0xa9   : > { %2693 = vmatpush3.bf16.msra.mxu0 %v2692_v59 }
  0xaa   : > { %2694 = vmatprep.subr.bf16.mxu0 %v3128_v0 }
  0xac   : > { %2509 = vmatmul.mubr.f32.vlgmr.msra.gmra.mrb[0].mxu0 %v3451_v46 }
  0xad   : > { %2696 = vmatpush3.bf16.msra.mxu0 %v3409_v17  ;;  %2519 = vmatprep.mubr.msk.f32.mxu0 %vm3129_vm0, %v3130_v1 }
  0xae   : > { %2697 = vmatprep.subr.bf16.mxu0 %v3128_v0 }
  0xb1   : > { %2699 = vmatpush3.bf16.msra.mxu0 %v3424_v24 }
  0xb2   : > { %2700 = vmatprep.subr.bf16.mxu0 %v3128_v0 }
  0xb4   : > { %2520 = vmatmul.mubr.f32.vlgmr.msra.gmra.mrb[0].mxu0 %v3454_v51 }
  0xb5   : > { %2702 = vmatpush3.bf16.msra.mxu0 %v2701_v60  ;;  %2530 = vmatprep.mubr.msk.f32.mxu0 %vm3129_vm0, %v3130_v1  ;;  %v1178_v60 = vld [vmem:[#allocation8] sm:$0xff] }
  0xb6   : > { %2703 = vmatprep.subr.bf16.mxu0 %v3128_v0  ;;  %v1183_v62 = vand.u32 4294901760, %v1178_v60 }
  0xb9   : > { %2705 = vmatpush3.bf16.msra.mxu0 %v2704_v61  ;;  %v1179_v61 = vld [vmem:[#allocation8 + $0x8] sm:$0xff] }
  0xba   : > { %2706 = vmatprep.subr.bf16.mxu0 %v3128_v0  ;;  %v1186_v63 = vand.u32 4294901760, %v1179_v61 }
  0xbc   : > { %2531 = vmatmul.mubr.f32.vlgmr.msra.gmra.mrb[0].mxu0 %v3448_v45  ;;  %v2713_v2 = vpack.c.bf16 %v1186_v63, %v1183_v62 }
  0xbd   : > { %2708 = vmatpush3.bf16.msra.mxu0 %v3409_v17  ;;  %2541 = vmatprep.mubr.msk.f32.mxu0 %vm3129_vm0, %v3130_v1 }
  0xbe   : > { %2709 = vmatprep.subr.bf16.mxu0 %v3128_v0  ;;  %2732 = vmatpush3.bf16.msra.mxu1 %v2713_v2 }
  0xbf   : > { %2733 = vmatprep.subr.bf16.mxu1 %v3128_v0 }
  0xc1   : > { %2711 = vmatpush3.bf16.msra.mxu0 %v3424_v24 }
  0xc2   : > { %2712 = vmatprep.subr.bf16.mxu0 %v3128_v0 }
  0xc4   : > { %2542 = vmatmul.mubr.f32.vlgmr.msra.gmra.mrb[0].mxu0 %v3448_v45 }
  0xc5   : > { %2552 = vmatprep.mubr.msk.f32.mxu0 %vm3129_vm0, %v3130_v1  ;;  %2714 = vmatpush3.bf16.msra.mxu0 %v2713_v2 }
  0xc6   : > { %2715 = vmatprep.subr.bf16.mxu0 %v3128_v0 }
 0x197   : > { %v824_v8 = vpop.f32.mrb[0].mxu0 }
 0x198   : > { %v829_v11 = vcombine.high %v824_v8, %v824_v8  ;;  %v836_v15 = vrot.slane %v824_v8, %v835_v7  ;;  %v2543_v17 = vpop.f32.mrb[1].mxu0  ;;  %v3514_v8 = vsub.f32 %v1178_v60, %v1183_v62 }
 0x19a   : > { %v843_v20 = vrot.slane %v829_v11, %v835_v7  ;;  %v844_v21 = vcombine.high %v836_v15, %v836_v15  ;;  %v852_v22 = vrot.slane %v836_v15, %v835_v7  ;;  %v3516_v11 = vsub.f32 %v1179_v61, %v1186_v63 }
 0x19c   : > { %v845_v23 = vcombine.high %v843_v20, %v843_v20  ;;  %v859_v24 = vrot.slane %v843_v20, %v835_v7  ;;  %v866_v25 = vrot.slane %v844_v21, %v835_v7  ;;  %v881_v26 = vrot.slane %v852_v22, %v880_v16 }
 0x19d   : > { %v874_v27 = vcombine.high %v852_v22, %v852_v22  ;;  %v1271_v17 = vand.u32 4294901760, %v3516_v11  ;;  %v3522_v20 = vsub.f32 %v1180_v4, %v1189_v6 }
 0x19e   : > { %v918_v28 = vmul.f32 %v881_v26, %v3393_v9  ;;  %v885_v29 = vrot.slane %v866_v25, %v880_v16  ;;  %v876_v30 = vcombine.high %v866_v25, %v866_v25  ;;  %v897_v32 = vrot.slane %v859_v24, %v880_v16  ;;  %v1176_v25 = vld [vmem:[#allocation7 + $0x10] sm:$0xff] }
 0x19f   : > { %v889_v31 = vrot.slane %v874_v27, %v880_v16  ;;  %v873_v34 = vrot.slane %v845_v23, %v835_v7  ;;  %v875_v38 = vcombine.high %v859_v24, %v859_v24  ;;  %v1192_v7 = vand.u32 4294901760, %v1181_v5  ;;  %v1174_v23 = vld [vmem:[#allocation7] sm:$0xff]  ;;  %v1175_v24 = vld [vmem:[#allocation7 + $0x8] sm:$0xff] }
 0x1a0   : > { %v926_v35 = vsel %vm340_vm8, %v918_v28, 0.0  ;;  %v919_v36 = vmul.f32 %v885_v29, %v3396_v10  ;;  %v893_v37 = vrot.slane %v876_v30, %v880_v16  ;;  %v922_v47 = vmul.f32 %v897_v32, %v3405_v14  ;;  %v1177_v28 = vld [vmem:[#allocation7 + $0x18] sm:$0xff] }
 0x1a1   : > { %927 = vadd.xlane.f32.xlu0 %v926_v35  ;;  %v920_v39 = vmul.f32 %v889_v31, %v3399_v12  ;;  %v901_v42 = vrot.slane %v873_v34, %v880_v16  ;;  %v877_v43 = vcombine.high %v873_v34, %v873_v34  ;;  %v905_v48 = vrot.slane %v875_v38, %v880_v16 }
 0x1a2   : > { %v921_v41 = vmul.f32 %v893_v37, %v3402_v13  ;;  %v929_v44 = vsel %vm340_vm8, %v919_v36, 0.0  ;;  %v938_v53 = vsel %vm340_vm8, %v922_v47, 0.0  ;;  %v2716_v15 = vpack.c.bf16 %v1192_v7, %v1189_v6 }
 0x1a3   : > { %v932_v40 = vsel %vm340_vm8, %v920_v39, 0.0  ;;  %v923_v50 = vmul.f32 %v901_v42, %v3412_v18  ;;  %v909_v52 = vrot.slane %v877_v43, %v880_v16  ;;  %v924_v54 = vmul.f32 %v905_v48, %v3415_v19 }
 0x1a4   : > { %933 = vadd.xlane.f32.xlu1 %v932_v40  ;;  %v935_v49 = vsel %vm340_vm8, %v921_v41, 0.0  ;;  %2735 = vmatpush3.bf16.msra.mxu1 %v2716_v15  ;;  %v1264_v16 = vand.u32 4294901760, %v3514_v8  ;;  %v3524_v21 = vsub.f32 %v1181_v5, %v1192_v7  ;;  %v1685_v26 = vand.u32 4294901760, %v1174_v23 }
 0x1a5   : > { %930 = vadd.xlane.f32.xlu0 %v929_v44  ;;  %v941_v55 = vsel %vm340_vm8, %v923_v50, 0.0  ;;  %v925_v57 = vmul.f32 %v909_v52, %v3434_v33  ;;  %v944_v58 = vsel %vm340_vm8, %v924_v54, 0.0  ;;  %2717 = vmatpush3.bf16.msra.mxu0 %v2716_v15  ;;  %v1688_v27 = vand.u32 4294901760, %v1175_v24 }
 0x1a6   : > { %2736 = vmatprep.subr.bf16.mxu1 %v3128_v0  ;;  %2718 = vmatprep.subr.bf16.mxu0 %v3128_v0  ;;  %v2737_v22 = vpack.c.bf16 %v1271_v17, %v1264_v16  ;;  %v1691_v29 = vand.u32 4294901760, %v1176_v25  ;;  %v1278_v30 = vand.u32 4294901760, %v3522_v20  ;;  %v1285_v31 = vand.u32 4294901760, %v3524_v21 }
 0x1a7   : > { %v947_v59 = vsel %vm340_vm8, %v925_v57, 0.0  ;;  %2586 = vmatmul.mubr.f32.vlgmr.msra.gmra.mrb[0].mxu1 %v3454_v51  ;;  %v1694_v32 = vand.u32 4294901760, %v1177_v28  ;;  %v3533_v34 = vsub.f32 %v1174_v23, %v1685_v26  ;;  %v3535_v51 = vsub.f32 %v1175_v24, %v1688_v27 }
 0x1a8   : > { %936 = vadd.xlane.f32.xlu1 %v935_v49  ;;  %2553 = vmatmul.mubr.f32.vlgmr.msra.gmra.mrb[2].mxu0 %v3458_v56  ;;  %v3537_v35 = vsub.f32 %v1176_v25, %v1691_v29  ;;  %v2740_v36 = vpack.c.bf16 %v1285_v31, %v1278_v30  ;;  %v3548_v56 = vpack.c.bf16 %v1688_v27, %v1685_v26 }
 0x1a9   : > { %939 = vadd.xlane.f32.xlu0 %v938_v53  ;;  %2738 = vmatpush3.bf16.msra.mxu1 %v2737_v22  ;;  %v3539_v37 = vsub.f32 %v1177_v28, %v1694_v32  ;;  %v3553_v38 = vpack.c.bf16 %v1694_v32, %v1691_v29  ;;  %v1766_v39 = vand.u32 4294901760, %v3533_v34  ;;  %v1773_v40 = vand.u32 4294901760, %v3535_v51 }
 0x1aa   : > { %2596 = vmatprep.mubr.msk.f32.mxu1 %vm3129_vm0, %v3130_v1  ;;  %2739 = vmatprep.subr.bf16.mxu1 %v3128_v0  ;;  %v1780_v47 = vand.u32 4294901760, %v3537_v35  ;;  %v1272_v57 = vsub.f32 %v3516_v11, %v1271_v17  ;;  %v2761_v62 = vpack.c.bf16 %v3535_v51, %v3533_v34  ;;  %v1279_v63 = vsub.f32 %v3522_v20, %v1278_v30 }
 0x1ab   : > { %2563 = vmatprep.mubr.msk.f32.mxu0 %vm3129_vm0, %v3130_v1  ;;  %v1767_v41 = vsub.f32 %v3533_v34, %v1766_v39  ;;  %v1774_v42 = vsub.f32 %v3535_v51, %v1773_v40  ;;  %v1787_v48 = vand.u32 4294901760, %v3539_v37  ;;  %v2764_v6 = vpack.c.bf16 %v3539_v37, %v3537_v35 }
 0x1ac   : > { %942 = vadd.xlane.f32.xlu1 %v941_v55  ;;  %v1781_v50 = vsub.f32 %v3537_v35, %v1780_v47  ;;  %v1265_v55 = vsub.f32 %v3514_v8, %v1264_v16  ;;  %v1273_v60 = vand.u32 4294901760, %v1272_v57  ;;  %v1280_v4 = vand.u32 4294901760, %v1279_v63 }
 0x1ad   : > { %945 = vadd.xlane.f32.xlu0 %v944_v58  ;;  %2741 = vmatpush3.bf16.msra.mxu1 %v2740_v36  ;;  %v1768_v43 = vand.u32 4294901760, %v1767_v41  ;;  %v1775_v44 = vand.u32 4294901760, %v1774_v42  ;;  %v1788_v52 = vsub.f32 %v3539_v37, %v1787_v48  ;;  %v2728_v16 = vpack.c.bf16 %v3524_v21, %v3522_v20 }
 0x1ae   : > { %2742 = vmatprep.subr.bf16.mxu1 %v3128_v0  ;;  %v1782_v53 = vand.u32 4294901760, %v1781_v50  ;;  %v3590_v22 = vpack.c.bf16 %v1773_v40, %v1766_v39 }
 0x1af   : > { %v3566_v49 = vpack.c.bf16 %v1775_v44, %v1768_v43  ;;  %v1789_v54 = vand.u32 4294901760, %v1788_v52 }
 0x1b0   : > { %948 = vadd.xlane.f32.xlu1 %v947_v59  ;;  %2597 = vmatmul.mubr.f32.vlgmr.msra.gmra.mrb[0].mxu1 %v3448_v45  ;;  %v1266_v59 = vand.u32 4294901760, %v1265_v55 }
 0x1b1   : > { %2744 = vmatpush3.bf16.msra.mxu1 %v2713_v2  ;;  %2607 = vmatprep.mubr.msk.f32.mxu1 %vm3129_vm0, %v3130_v1  ;;  %v3572_v58 = vpack.c.bf16 %v1789_v54, %v1782_v53  ;;  %v1286_v2 = vsub.f32 %v3524_v21, %v1285_v31 }
 0x1b2   : > { %2745 = vmatprep.subr.bf16.mxu1 %v3128_v0  ;;  %v2719_v61 = vpack.c.bf16 %v1273_v60, %v1266_v59 }
 0x1b3   : > { %v1287_v5 = vand.u32 4294901760, %v1286_v2 }
 0x1b4   : > { %2720 = vmatpush3.bf16.msra.mxu0 %v2719_v61 }
 0x1b5   : > { %2747 = vmatpush3.bf16.msra.mxu1 %v2716_v15  ;;  %2721 = vmatprep.subr.bf16.mxu0 %v3128_v0  ;;  %v2722_v7 = vpack.c.bf16 %v1287_v5, %v1280_v4  ;;  %v2725_v15 = vpack.c.bf16 %v3516_v11, %v3514_v8  ;;  %v3593_v8 = vpack.c.bf16 %v1787_v48, %v1780_v47 }
 0x1b6   : > { %2748 = vmatprep.subr.bf16.mxu1 %v3128_v0 }
 0x1b8   : > { %2608 = vmatmul.mubr.f32.vlgmr.msra.gmra.mrb[0].mxu1 %v3448_v45  ;;  %2723 = vmatpush3.bf16.msra.mxu0 %v2722_v7 }
 0x1b9   : > { %2750 = vmatpush3.bf16.msra.mxu1 %v3548_v56  ;;  %2618 = vmatprep.mubr.msk.f32.mxu1 %vm3129_vm0, %v3130_v1 }
 0x1ba   : > { %2751 = vmatprep.subr.bf16.mxu1 %v3128_v0  ;;  %2724 = vmatprep.subr.bf16.mxu0 %v3128_v0 }
 0x1bb   : > { %2564 = vmatmul.mubr.f32.vlgmr.msra.gmra.mrb[2].mxu0 %v3448_v45 }
 0x1bc   : > { %2726 = vmatpush3.bf16.msra.mxu0 %v2725_v15  ;;  %2574 = vmatprep.mubr.msk.f32.mxu0 %vm3129_vm0, %v3130_v1 }
 0x1bd   : > { %2753 = vmatpush3.bf16.msra.mxu1 %v3553_v38  ;;  %2727 = vmatprep.subr.bf16.mxu0 %v3128_v0 }
 0x1be   : > { %2754 = vmatprep.subr.bf16.mxu1 %v3128_v0 }
 0x1c0   : > { %2729 = vmatpush3.bf16.msra.mxu0 %v2728_v16 }
 0x1c3   : > { %2575 = vmatmul.mubr.f32.vlgmr.msra.gmra.mrb[2].mxu0 %v3451_v46 }
 0x22e   : > { %v928_v17 = vpop.xlane.xlu0 %927 }
 0x22f   : > { %v950_v23 = vrot.slane %v928_v17, 4 }
 0x231   : > { %v951_v11 = vmax.f32 %v928_v17, %v950_v23  ;;  %v934_v45 = vpop.xlane.xlu1 %933 }
 0x232   : > { %v962_v24 = vrot.slane %v934_v45, 4  ;;  %v931_v25 = vpop.xlane.xlu0 %930 }
 0x233   : > { %v952_v26 = vrot.slane %v951_v11, 2  ;;  %v956_v20 = vrot.slane %v931_v25, 4 }
 0x234   : > { %v963_v21 = vmax.f32 %v934_v45, %v962_v24 }
 0x235   : > { %v953_v27 = vmax.f32 %v951_v11, %v952_v26  ;;  %v957_v28 = vmax.f32 %v931_v25, %v956_v20  ;;  %v937_v29 = vpop.xlane.xlu1 %936 }
 0x236   : > { %v964_v30 = vrot.slane %v963_v21, 2  ;;  %v968_v31 = vrot.slane %v937_v29, 4  ;;  %v940_v32 = vpop.xlane.xlu0 %939 }
 0x237   : > { %v954_v36 = vrot.slane %v953_v27, 1  ;;  %v958_v39 = vrot.slane %v957_v28, 2  ;;  %v974_v40 = vrot.slane %v940_v32, 4 }
 0x238   : > { %v965_v41 = vmax.f32 %v963_v21, %v964_v30  ;;  %v969_v46 = vmax.f32 %v937_v29, %v968_v31 }
 0x239   : > { %v955_v42 = vmax.f32 %v953_v27, %v954_v36  ;;  %v959_v43 = vmax.f32 %v957_v28, %v958_v39  ;;  %v975_v44 = vmax.f32 %v940_v32, %v974_v40  ;;  %v943_v47 = vpop.xlane.xlu1 %942 }
 0x23a   : > { %v966_v48 = vrot.slane %v965_v41, 1  ;;  %v970_v50 = vrot.slane %v969_v46, 2  ;;  %v980_v52 = vrot.slane %v943_v47, 4  ;;  %v946_v53 = vpop.xlane.xlu0 %945 }
 0x23b   : > { %v998_v54 = vsub.f32 %v928_v17, %v955_v42  ;;  %v960_v55 = vrot.slane %v959_v43, 1  ;;  %v976_v57 = vrot.slane %v975_v44, 2  ;;  %v986_v59 = vrot.slane %v946_v53, 4 }
 0x23c   : > { %v967_v60 = vmax.f32 %v965_v41, %v966_v48  ;;  %v971_v61 = vmax.f32 %v969_v46, %v970_v50  ;;  %v981_v63 = vmax.f32 %v943_v47, %v980_v52 }
 0x23d   : > { %v1006_v2 = vmul.f32 1.442695, %v998_v54  ;;  %v961_v4 = vmax.f32 %v959_v43, %v960_v55  ;;  %v977_v5 = vmax.f32 %v975_v44, %v976_v57  ;;  %v987_v7 = vmax.f32 %v946_v53, %v986_v59  ;;  %v949_v15 = vpop.xlane.xlu1 %948 }
 0x23e   : > { %v1000_v16 = vsub.f32 %v934_v45, %v967_v60  ;;  %v972_v23 = vrot.slane %v971_v61, 1  ;;  %v982_v11 = vrot.slane %v981_v63, 2  ;;  %v992_v24 = vrot.slane %v949_v15, 4 }
 0x23f   : > { %2898 = vpow2.f32 %v1006_v2  ;;  %v999_v26 = vsub.f32 %v931_v25, %v961_v4  ;;  %v978_v20 = vrot.slane %v977_v5, 1  ;;  %v988_v21 = vrot.slane %v987_v7, 2 }
 0x240   : > { %v1010_v17 = vmul.f32 1.442695, %v1000_v16  ;;  %v973_v27 = vmax.f32 %v971_v61, %v972_v23  ;;  %v983_v28 = vmax.f32 %v981_v63, %v982_v11  ;;  %v993_v30 = vmax.f32 %v949_v15, %v992_v24 }
 0x241   : > { %v1008_v31 = vmul.f32 1.442695, %v999_v26  ;;  %v979_v36 = vmax.f32 %v977_v5, %v978_v20  ;;  %v989_v39 = vmax.f32 %v987_v7, %v988_v21 }
 0x242   : > { %2900 = vpow2.f32 %v1010_v17  ;;  %v1001_v40 = vsub.f32 %v937_v29, %v973_v27  ;;  %v984_v41 = vrot.slane %v983_v28, 1  ;;  %v994_v46 = vrot.slane %v993_v30, 2 }
 0x243   : > { %2902 = vpow2.f32 %v1008_v31  ;;  %v1002_v45 = vsub.f32 %v940_v32, %v979_v36  ;;  %v990_v42 = vrot.slane %v989_v39, 1 }
 0x244   : > { %v1012_v43 = vmul.f32 1.442695, %v1001_v40  ;;  %v985_v44 = vmax.f32 %v983_v28, %v984_v41  ;;  %v995_v48 = vmax.f32 %v993_v30, %v994_v46 }
 0x245   : > { %v1014_v25 = vmul.f32 1.442695, %v1002_v45  ;;  %v991_v50 = vmax.f32 %v989_v39, %v990_v42 }
 0x246   : > { %2904 = vpow2.f32 %v1012_v43  ;;  %v1003_v52 = vsub.f32 %v943_v47, %v985_v44  ;;  %v996_v54 = vrot.slane %v995_v48, 1 }
 0x247   : > { %2906 = vpow2.f32 %v1014_v25  ;;  %v1004_v55 = vsub.f32 %v946_v53, %v991_v50 }
 0x248   : > { %v1016_v57 = vmul.f32 1.442695, %v1003_v52  ;;  %v997_v59 = vmax.f32 %v995_v48, %v996_v54 }
 0x249   : > { %v3595_v60 = vpop.eup %2898  ;;  %v1018_v29 = vmul.f32 1.442695, %v1004_v55 }
 0x24a   : > { %v1022_v61 = vrot.slane %v3595_v60, 4  ;;  %2908 = vpow2.f32 %v1016_v57  ;;  %v1005_v32 = vsub.f32 %v949_v15, %v997_v59 }
 0x24b   : > { %2910 = vpow2.f32 %v1018_v29 }
 0x24c   : > { %v3598_v63 = vpop.eup %2900  ;;  %v1023_v2 = vadd.f32 %v3595_v60, %v1022_v61  ;;  %v1020_v4 = vmul.f32 1.442695, %v1005_v32 }
 0x24d   : > { %v3601_v5 = vpop.eup %2902  ;;  %v1034_v47 = vrot.slane %v3598_v63, 4 }
 0x24e   : > { %v1024_v53 = vrot.slane %v1023_v2, 2  ;;  %v1028_v7 = vrot.slane %v3601_v5, 4  ;;  %2912 = vpow2.f32 %v1020_v4 }
 0x24f   : > { %v1035_v16 = vadd.f32 %v3598_v63, %v1034_v47 }
 0x250   : > { %v3606_v23 = vpop.eup %2904  ;;  %v1025_v11 = vadd.f32 %v1024_v53, %v1023_v2  ;;  %v1029_v15 = vadd.f32 %v3601_v5, %v1028_v7 }
 0x251   : > { %v3609_v24 = vpop.eup %2906  ;;  %v1036_v26 = vrot.slane %v1035_v16, 2  ;;  %v1040_v20 = vrot.slane %v3606_v23, 4 }
 0x252   : > { %v1026_v21 = vrot.slane %v1025_v11, 1  ;;  %v1030_v17 = vrot.slane %v1029_v15, 2  ;;  %v1046_v27 = vrot.slane %v3609_v24, 4 }
 0x253   : > { %v1037_v28 = vadd.f32 %v1036_v26, %v1035_v16  ;;  %v1041_v30 = vadd.f32 %v3606_v23, %v1040_v20 }
 0x254   : > { %v3614_v31 = vpop.eup %2908  ;;  %v1027_v36 = vadd.f32 %v1026_v21, %v1025_v11  ;;  %v1031_v39 = vadd.f32 %v1030_v17, %v1029_v15  ;;  %v1047_v40 = vadd.f32 %v3609_v24, %v1046_v27 }
 0x255   : > { %v3617_v41 = vpop.eup %2910  ;;  %v1038_v46 = vrot.slane %v1037_v28, 1  ;;  %v1042_v45 = vrot.slane %v1041_v30, 2  ;;  %v1052_v42 = vrot.slane %v3614_v31, 4 }
 0x256   : > { %2914 = vrcp.f32 %v1027_v36  ;;  %v1032_v43 = vrot.slane %v1031_v39, 1  ;;  %v1048_v44 = vrot.slane %v1047_v40, 2  ;;  %v1058_v48 = vrot.slane %v3617_v41, 4 }
 0x257   : > { %v1039_v25 = vadd.f32 %v1038_v46, %v1037_v28  ;;  %v1043_v50 = vadd.f32 %v1042_v45, %v1041_v30  ;;  %v1053_v52 = vadd.f32 %v3614_v31, %v1052_v42 }
 0x258   : > { %v3622_v54 = vpop.eup %2912  ;;  %v1033_v55 = vadd.f32 %v1032_v43, %v1031_v39  ;;  %v1049_v57 = vadd.f32 %v1048_v44, %v1047_v40  ;;  %v1059_v59 = vadd.f32 %v3617_v41, %v1058_v48 }
 0x259   : > { %2916 = vrcp.f32 %v1039_v25  ;;  %v1044_v29 = vrot.slane %v1043_v50, 1  ;;  %v1054_v61 = vrot.slane %v1053_v52, 2  ;;  %v1064_v32 = vrot.slane %v3622_v54, 4 }
 0x25a   : > { %2918 = vrcp.f32 %v1033_v55  ;;  %v1050_v2 = vrot.slane %v1049_v57, 1  ;;  %v1060_v4 = vrot.slane %v1059_v59, 2 }
 0x25b   : > { %v1045_v47 = vadd.f32 %v1044_v29, %v1043_v50  ;;  %v1055_v53 = vadd.f32 %v1054_v61, %v1053_v52  ;;  %v1065_v7 = vadd.f32 %v3622_v54, %v1064_v32 }
 0x25c   : > { %v1051_v16 = vadd.f32 %v1050_v2, %v1049_v57  ;;  %v1061_v11 = vadd.f32 %v1060_v4, %v1059_v59 }
 0x25d   : > { %2920 = vrcp.f32 %v1045_v47  ;;  %v1056_v15 = vrot.slane %v1055_v53, 1  ;;  %v1066_v26 = vrot.slane %v1065_v7, 2 }
 0x25e   : > { %2922 = vrcp.f32 %v1051_v16  ;;  %v1062_v20 = vrot.slane %v1061_v11, 1 }
 0x25f   : > { %v1057_v21 = vadd.f32 %v1056_v15, %v1055_v53  ;;  %v1067_v17 = vadd.f32 %v1066_v26, %v1065_v7 }
 0x260   : > { %v2915_v27 = vpop.eup %2914  ;;  %v1063_v28 = vadd.f32 %v1062_v20, %v1061_v11 }
 0x261   : > { %v1078_v30 = vmul.f32 %v2915_v27, %v1027_v36  ;;  %2924 = vrcp.f32 %v1057_v21  ;;  %v1068_v39 = vrot.slane %v1067_v17, 1 }
 0x262   : > { %2926 = vrcp.f32 %v1063_v28 }
 0x263   : > { %v2917_v40 = vpop.eup %2916  ;;  %v1086_v46 = vsub.f32 2.0, %v1078_v30  ;;  %v1069_v45 = vadd.f32 %v1068_v39, %v1067_v17 }
 0x264   : > { %v2919_v42 = vpop.eup %2918  ;;  %v1080_v43 = vmul.f32 %v2917_v40, %v1039_v25 }
 0x265   : > { %v1094_v44 = vmul.f32 %v2915_v27, %v1086_v46  ;;  %v1079_v48 = vmul.f32 %v2919_v42, %v1033_v55  ;;  %2928 = vrcp.f32 %v1069_v45 }
 0x266   : > { %v1088_v50 = vsub.f32 2.0, %v1080_v43 }
 0x267   : > { %v2921_v52 = vpop.eup %2920  ;;  %v1102_v57 = vmul.f32 %v3595_v60, %v1094_v44  ;;  %v1087_v59 = vsub.f32 2.0, %v1079_v48 }
 0x268   : > { %v2923_v29 = vpop.eup %2922  ;;  %v1096_v61 = vmul.f32 %v2917_v40, %v1088_v50  ;;  %v1081_v32 = vmul.f32 %v2921_v52, %v1045_v47 }
 0x269   : > { %v1110_v36 = vmul.f32 %v1102_v57, %v3393_v9  ;;  %v1095_v2 = vmul.f32 %v2919_v42, %v1087_v59  ;;  %v1082_v4 = vmul.f32 %v2923_v29, %v1051_v16  ;;  %v2184_v55 = vrot.slane %v1102_v57, %v3494_v3 }
 0x26a   : > { %v1104_v53 = vmul.f32 %v3598_v63, %v1096_v61  ;;  %v1089_v7 = vsub.f32 2.0, %v1081_v32 }
 0x26b   : > { %v2925_v11 = vpop.eup %2924  ;;  %v1118_v25 = vsel %vm340_vm8, %v1110_v36, 0.0  ;;  %v1103_v15 = vmul.f32 %v3601_v5, %v1095_v2  ;;  %v1090_v26 = vsub.f32 2.0, %v1082_v4 }
 0x26c   : > { %v2927_v60 = vpop.eup %2926  ;;  %v1119_v20 = vrot.slane %v1118_v25, 4  ;;  %v1112_v17 = vmul.f32 %v1104_v53, %v3399_v12  ;;  %v2192_v9 = vrot.slane %v1104_v53, %v3494_v3  ;;  %v1097_v47 = vmul.f32 %v2921_v52, %v1089_v7 }
 0x26d   : > { %v1111_v16 = vmul.f32 %v1103_v15, %v3396_v10  ;;  %v2188_v63 = vrot.slane %v1103_v15, %v3494_v3  ;;  %v1098_v27 = vmul.f32 %v2923_v29, %v1090_v26  ;;  %v1083_v30 = vmul.f32 %v2925_v11, %v1057_v21 }
 0x26e   : > { %v1120_v39 = vadd.f32 %v1119_v20, %v1118_v25  ;;  %v1132_v40 = vsel %vm340_vm8, %v1112_v17, 0.0  ;;  %v1105_v5 = vmul.f32 %v3606_v23, %v1097_v47  ;;  %v1084_v46 = vmul.f32 %v2927_v60, %v1063_v28 }
 0x26f   : > { %v2929_v42 = vpop.eup %2928  ;;  %v1133_v43 = vrot.slane %v1132_v40, 4  ;;  %v1125_v12 = vsel %vm340_vm8, %v1111_v16, 0.0  ;;  %v2213_v44 = vsel %vm321_vm1, %v2188_v63, %v2184_v55  ;;  %v1106_v48 = vmul.f32 %v3609_v24, %v1098_v27 }
 0x270   : > { %v1121_v10 = vrot.slane %v1120_v39, 2  ;;  %v1126_v50 = vrot.slane %v1125_v12, 4  ;;  %v2214_v21 = vsel %vm324_vm2, %v2192_v9, %v2213_v44  ;;  %v1113_v52 = vmul.f32 %v1105_v5, %v3402_v13 }
 0x271   : > { %v2196_v23 = vrot.slane %v1105_v5, %v3494_v3  ;;  %v1114_v28 = vmul.f32 %v1106_v48, %v3405_v14  ;;  %v2200_v57 = vrot.slane %v1106_v48, %v3494_v3  ;;  %v1091_v59 = vsub.f32 2.0, %v1083_v30 }
 0x272   : > { %v1127_v29 = vadd.f32 %v1126_v50, %v1125_v12  ;;  %v1092_v61 = vsub.f32 2.0, %v1084_v46  ;;  %v1085_v32 = vmul.f32 %v2929_v42, %v1069_v45  ;;  %v1122_v24 = vadd.f32 %v1121_v10, %v1120_v39 }
 0x273   : > { %v2215_v36 = vsel %vm327_vm3, %v2196_v23, %v2214_v21  ;;  %v1099_v2 = vmul.f32 %v2925_v11, %v1091_v59  ;;  %v1134_v4 = vadd.f32 %v1133_v43, %v1132_v40  ;;  %v1139_v13 = vsel %vm340_vm8, %v1113_v52, 0.0 }
 0x274   : > { %v1128_v53 = vrot.slane %v1127_v29, 2  ;;  %v1100_v7 = vmul.f32 %v2927_v60, %v1092_v61  ;;  %v1093_v14 = vsub.f32 2.0, %v1085_v32  ;;  %v2216_v25 = vsel %vm330_vm4, %v2200_v57, %v2215_v36 }
 0x275   : > { %v1107_v55 = vmul.f32 %v3614_v31, %v1099_v2  ;;  %v1135_v45 = vrot.slane %v1134_v4, 2  ;;  %v1140_v15 = vrot.slane %v1139_v13, 4  ;;  %v1146_v17 = vsel %vm340_vm8, %v1114_v28, 0.0 }
 0x276   : > { %v1108_v26 = vmul.f32 %v3617_v41, %v1100_v7  ;;  %v1101_v11 = vmul.f32 %v2929_v42, %v1093_v14  ;;  %v1129_v20 = vadd.f32 %v1128_v53, %v1127_v29  ;;  %v1123_v60 = vrot.slane %v1122_v24, 1 }
 0x277   : > { %v2204_v9 = vrot.slane %v1107_v55, %v3494_v3  ;;  %v1115_v47 = vmul.f32 %v1107_v55, %v3412_v18  ;;  %v1136_v16 = vadd.f32 %v1135_v45, %v1134_v4  ;;  %v1141_v40 = vadd.f32 %v1140_v15, %v1139_v13 }
 0x278   : > { %v2208_v63 = vrot.slane %v1108_v26, %v3494_v3  ;;  %v1109_v27 = vmul.f32 %v3622_v54, %v1101_v11  ;;  %v1116_v31 = vmul.f32 %v1108_v26, %v3415_v19  ;;  %v1130_v30 = vrot.slane %v1129_v20, 1 }
 0x279   : > { %v2217_v41 = vsel %vm333_vm5, %v2204_v9, %v2216_v25  ;;  %v1137_v39 = vrot.slane %v1136_v16, 1  ;;  %v1147_v5 = vrot.slane %v1146_v17, 4  ;;  %v1124_v54 = vadd.f32 %v1123_v60, %v1122_v24 }
 0x27a   : > { %v2218_v46 = vsel %vm336_vm6, %v2208_v63, %v2217_v41  ;;  %v2212_v18 = vrot.slane %v1109_v27, %v3494_v3  ;;  %v1117_v42 = vmul.f32 %v1109_v27, %v3434_v33  ;;  %v1131_v43 = vadd.f32 %v1130_v30, %v1129_v20 }
 0x27b   : > { %v1142_v12 = vrot.slane %v1141_v40, 2  ;;  %v1148_v19 = vadd.f32 %v1147_v5, %v1146_v17  ;;  %v1153_v44 = vsel %vm340_vm8, %v1115_v47, 0.0  ;;  %v1160_v50 = vsel %vm340_vm8, %v1116_v31, 0.0 }
 0x27c   : > { %v2219_v48 = vsel %vm338_vm7, %v2212_v18, %v2218_v46  ;;  %v1154_v10 = vrot.slane %v1153_v44, 4  ;;  %v1167_v21 = vsel %vm340_vm8, %v1117_v42, 0.0  ;;  %v1161_v3 = vrot.slane %v1160_v50, 4 }
 0x27d   : > { %2222 = vst.msk [vmem:[%s298_s13] sm:$0xff] %vm2221_vm9, %v2219_v48  ;;  %v1143_v52 = vadd.f32 %v1142_v12, %v1141_v40  ;;  %v1149_v23 = vrot.slane %v1148_v19, 2  ;;  %v1168_v28 = vrot.slane %v1167_v21, 4  ;;  %v1138_v33 = vadd.f32 %v1137_v39, %v1136_v16 }
 0x27e   : > { %v1155_v57 = vadd.f32 %v1154_v10, %v1153_v44  ;;  %v1675_v59 = vsel %vm321_vm1, %v1131_v43, %v1124_v54  ;;  %v1162_v32 = vadd.f32 %v1161_v3, %v1160_v50 }
 0x27f   : > { %v1144_v29 = vrot.slane %v1143_v52, 1  ;;  %v1150_v61 = vadd.f32 %v1149_v23, %v1148_v19  ;;  %v1169_v24 = vadd.f32 %v1168_v28, %v1167_v21  ;;  %v1676_v2 = vsel %vm324_vm2, %v1138_v33, %v1675_v59 }
 0x280   : > { %v1156_v36 = vrot.slane %v1155_v57, 2  ;;  %v1163_v53 = vrot.slane %v1162_v32, 2 }
 0x281   : > { %v1145_v4 = vadd.f32 %v1144_v29, %v1143_v52  ;;  %v1151_v13 = vrot.slane %v1150_v61, 1  ;;  %v1170_v7 = vrot.slane %v1169_v24, 2 }
 0x282   : > { %v1157_v14 = vadd.f32 %v1156_v36, %v1155_v57  ;;  %v1164_v55 = vadd.f32 %v1163_v53, %v1162_v32 }
 0x283   : > { %v1152_v25 = vadd.f32 %v1151_v13, %v1150_v61  ;;  %v1171_v45 = vadd.f32 %v1170_v7, %v1169_v24  ;;  %v1677_v15 = vsel %vm327_vm3, %v1145_v4, %v1676_v2 }
 0x284   : > { %v1158_v26 = vrot.slane %v1157_v14, 1  ;;  %v1165_v11 = vrot.slane %v1164_v55, 1 }
 0x285   : > { %v1172_v20 = vrot.slane %v1171_v45, 1  ;;  %v1678_v17 = vsel %vm330_vm4, %v1152_v25, %v1677_v15 }
 0x286   : > { %v1159_v9 = vadd.f32 %v1158_v26, %v1157_v14  ;;  %v1166_v47 = vadd.f32 %v1165_v11, %v1164_v55 }
 0x287   : > { %v1173_v60 = vadd.f32 %v1172_v20, %v1171_v45 }
 0x288   : > { %v1679_v16 = vsel %vm333_vm5, %v1159_v9, %v1678_v17 }
 0x289   : > { %v1680_v63 = vsel %vm336_vm6, %v1166_v47, %v1679_v16 }
 0x28a   : > { %v1681_v27 = vsel %vm338_vm7, %v1173_v60, %v1680_v63 }
 0x28b   : > { %v1682_v31 = vsel %vm340_vm8, %v1681_v27, 0 }
 0x28c   : > { %v1753_v30 = vand.u32 4294901760, %v1682_v31 }
 0x28e   : > { %v1754_v41 = vsub.f32 %v1682_v31, %v1753_v30 }
 0x290   : > { %v1755_v39 = vand.u32 4294901760, %v1754_v41 }
 0x292   : > { %v1756_v40 = vsub.f32 %v1754_v41, %v1755_v39 }
 0x294   : > { %v1757_v5 = vand.u32 4294901760, %v1756_v40 }
 0x296   : > { %2619 = vmatmul.mubr.f32.vlgmr.msra.gmra.mrb[0].mxu1 %v1757_v5  ;;  %v1428_v34 = vpop.f32.mrb[2].mxu0 }
 0x297   : > { %2756 = vmatpush3.bf16.msra.mxu1 %v3566_v49  ;;  %2629 = vmatprep.mubr.msk.f32.mxu1 %vm3129_vm0, %v3130_v1  ;;  %v2576_v51 = vpop.f32.mrb[3].mxu0 }
 0x298   : > { %2757 = vmatprep.subr.bf16.mxu1 %v3128_v0 }
 0x29b   : > { %2759 = vmatpush3.bf16.msra.mxu1 %v3572_v58 }
 0x29c   : > { %2760 = vmatprep.subr.bf16.mxu1 %v3128_v0 }
 0x29e   : > { %2630 = vmatmul.mubr.f32.vlgmr.msra.gmra.mrb[0].mxu1 %v1753_v30 }
 0x29f   : > { %2762 = vmatpush3.bf16.msra.mxu1 %v2761_v62  ;;  %2640 = vmatprep.mubr.msk.f32.mxu1 %vm3129_vm0, %v3130_v1 }
 0x2a0   : > { %2763 = vmatprep.subr.bf16.mxu1 %v3128_v0 }
 0x2a3   : > { %2765 = vmatpush3.bf16.msra.mxu1 %v2764_v6 }
 0x2a4   : > { %2766 = vmatprep.subr.bf16.mxu1 %v3128_v0 }
 0x2a6   : > { %2641 = vmatmul.mubr.f32.vlgmr.msra.gmra.mrb[0].mxu1 %v1754_v41 }
 0x2a7   : > { %2768 = vmatpush3.bf16.msra.mxu1 %v3548_v56  ;;  %2651 = vmatprep.mubr.msk.f32.mxu1 %vm3129_vm0, %v3130_v1 }
 0x2a8   : > { %2769 = vmatprep.subr.bf16.mxu1 %v3128_v0 }
 0x2ab   : > { %2771 = vmatpush3.bf16.msra.mxu1 %v3553_v38 }
 0x2ac   : > { %2772 = vmatprep.subr.bf16.mxu1 %v3128_v0 }
 0x2ae   : > { %2652 = vmatmul.mubr.f32.vlgmr.msra.gmra.mrb[0].mxu1 %v1755_v39 }
 0x2af   : > { %2774 = vmatpush3.bf16.msra.mxu1 %v3590_v22  ;;  %2662 = vmatprep.mubr.msk.f32.mxu1 %vm3129_vm0, %v3130_v1 }
 0x2b0   : > { %2775 = vmatprep.subr.bf16.mxu1 %v3128_v0 }
 0x2b3   : > { %2777 = vmatpush3.bf16.msra.mxu1 %v3593_v8 }
 0x2b4   : > { %2778 = vmatprep.subr.bf16.mxu1 %v3128_v0 }
 0x2b6   : > { %2663 = vmatmul.mubr.f32.vlgmr.msra.gmra.mrb[0].mxu1 %v1753_v30 }
 0x2b7   : > { %2780 = vmatpush3.bf16.msra.mxu1 %v3548_v56  ;;  %2673 = vmatprep.mubr.msk.f32.mxu1 %vm3129_vm0, %v3130_v1 }
 0x2b8   : > { %2781 = vmatprep.subr.bf16.mxu1 %v3128_v0 }
 0x2bb   : > { %2783 = vmatpush3.bf16.msra.mxu1 %v3553_v38 }
 0x2be   : > { %2674 = vmatmul.mubr.f32.vlgmr.msra.gmra.mrb[0].mxu1 %v1753_v30 }
 0x391   : > { %v2165_v35 = vpop.f32.mrb[0].mxu1 }
 0x392   : > { %v2784_v37 = vadd.f32 %v2165_v35, %v1428_v34  ;;  %v2675_v49 = vpop.f32.mrb[1].mxu1 }
 0x394   : > { %2930 = vtanh.f32 %v2784_v37 }
 0x39e   : > { %v2931_v0 = vpop.eup %2930 }
 0x39f   : > { %2170 = vst.msk [vmem:[%s287_s28] sm:$0xff] %vm340_vm8, %v2931_v0 }
 0x3a0   : > { %3059 = shalt.err (!%p3056_p9)
}
 0x3a1   : > { %s3060_s29 = scalar_lea.hbm %s3723_s10, 128  ;;  %s3064_s27 = scalar_lea.hbm %s3772_s4, 256 }
 0x3a2   : > { %p3061_p0 = scmp.ne.s32.totalorder %s3723_s10, %s3060_s29  ;;  %p3065_p13 = scmp.lt.u32.totalorder %s3723_s10, %s3772_s4 }
 0x3a3   : > { %p3066_p6 = scmp.lt.u32.totalorder %s3064_s27, %s3060_s29  ;;  %p3068_p3 = scmp.lt.u32.totalorder %s3060_s29, %s3723_s10 }
 0x3a4   : > { %p3062_p11 = pnand %p3061_p0, %p3317_p5 }
 0x3a5   : > { %p3067_p10 = por %p3066_p6, %p3065_p13 }
 0x3a6   : > { %p3063_p8 = pneg %p3062_p11 }
 0x3a7   : > { %p3069_p7 = por %p3068_p3, %p3067_p10 }
 0x3a9   : > { %p3070_p12 = pnand %p3069_p7, %p3063_p8 }
 0x3ab   : > { %3073 = shalt.err (!%p3070_p12)
}
 0x3ac   : > { %2829 = dma.vmem_to_hbm [thread:$0]  (%p3317_p5), %s3725_s9, 128, %s3723_s10, %s2224_s8  }
 0x3ad PF: > { %s2256_s6 = sand.u32 1, %s3108_s18   ;;  %p3791_p1 = scmp.ne.s32.totalorder %s3778_s25, 0 }
 0x3ae   : > { %p3792_p2 = scmp.ge.s32.totalorder %s3120_s21, 2  ;;  %s2257_s28 = scalar_lea.sflag [#allocation4], %s2256_s6 }
 0x3b0   : > { %p2846_p4 = pnand %p3792_p2, %p3791_p1 }
 0x3b2   : > { %3103 = dma.done.wait (!%p2846_p4), %s2257_s28, 128  }
 0x3b3   : > { %3105 = vsyncadd (!%p2846_p4), %s2257_s28, 4294967168  ;;  %p21_p9 = scmp.ge.s32.totalorder %s3303_s14, 4   ;;  %s3793_s18 = smov %s3112_s19 }
 0x3b4   : > { %s3794_s19 = smov %s3116_s20  ;;  %s3795_s20 = smov %s3313_s30 }
 0x3b5   : > { %s3796_s21 = smov %s3303_s14  ;;  %23 = sbr.rel (!%p21_p9) target bundleno = 7 (0x7), region = 105 }
 0x3bc   :  { %2269 = vsyncpa [#allocation3], 1 }
 0x3bd   :  { %2271 = vsyncpa [#allocation3 + $0x1], 1 }
 0x3be   :  { %2272 = vsyncpa [#allocation6], 1 }
 0x3bf   :  { %2273 = vsyncpa [#allocation9], 1 }
 0x3c0   :  { %2274 = vsyncpa [#allocation4], 1 }
 0x3c1   :  { %2276 = vsyncpa [#allocation4 + $0x1], 1 }

</bundles_post_ra>
